<compile_context>
chip_gen: v7x
topology: tpu7x:2x2x1
jax: 0.10.0
libtpu: 0.0.40
codegen_flags: <defaults>
</compile_context>

<pallas_src>
import jax
import jax.numpy as jnp
from jax import lax
from jax.experimental import pallas as pl
from jax.experimental.pallas import tpu as pltpu

_LANE = 128
_SUBLANE = 8


def _round_up(a, b):
    return ((a + b - 1) // b) * b


def _make_kernel(tile_rows, rows, ragged):
    groups = tile_rows // _SUBLANE

    def kernel(x_ref, y_ref, out_ref, acc_ref):
        # x_ref, y_ref: (1, tile_rows, 128)  flattened-feature blocks
        # out_ref:      (1, 3, 8, 128)       per-batch sublane/lane partials
        # acc_ref:      (3, 8, 128) f32      small VMEM accumulator (12 KiB)
        c = pl.program_id(1)

        @pl.when(c == 0)
        def _():
            acc_ref[...] = jnp.zeros_like(acc_ref)

        x = x_ref[0].astype(jnp.float32)            # (tile_rows, 128)
        y = y_ref[0].astype(jnp.float32)

        if ragged:
            # The last chunk's DMA extends past `rows`; mask the garbage rows
            # to zero (zero padding is exact for x.y, x.x and y.y sums).
            row = c * tile_rows + lax.broadcasted_iota(
                jnp.int32, (tile_rows, _LANE), 0)
            valid = row < rows
            x = jnp.where(valid, x, 0.0)
            y = jnp.where(valid, y, 0.0)

        def fold(p):
            # (tile_rows,128) -> (8,128): sublane-aligned vreg adds (VALU only).
            return jnp.sum(p.reshape(groups, _SUBLANE, _LANE), axis=0)

        acc_ref[0] += fold(x * y)                   # dot-product partials
        acc_ref[1] += fold(x * x)                   # ||x||^2 partials
        acc_ref[2] += fold(y * y)                   # ||y||^2 partials

        @pl.when(c == pl.num_programs(1) - 1)
        def _():
            out_ref[0] = acc_ref[...]

    return kernel


def feature_distance(feature_dot, feature_tar, eps=1e-6, max_tile_rows=4096):
    """Pallas TPU implementation of FeatureDistance.forward."""
    assert feature_dot.shape == feature_tar.shape
    B = feature_dot.shape[0]
    x = feature_dot.reshape(B, -1)
    y = feature_tar.reshape(B, -1)
    n = x.shape[1]

    itemsize = jnp.dtype(x.dtype).itemsize
    # Sublane packing granule: 8 rows for f32, 16 for bf16/f16, 32 for int8.
    granule = max(_SUBLANE, 32 // max(itemsize, 1))

    # Pad only to the (granule, 128) layout granule (<= granule*128-1 elements);
    # for the common aligned case (e.g. C*H*W multiple of 1024) this is a no-op,
    # so we don't pay an extra HBM read+write sweep before the kernel.
    n_pad = _round_up(n, granule * _LANE)
    if n_pad != n:
        x = jnp.pad(x, ((0, 0), (0, n_pad - n)))
        y = jnp.pad(y, ((0, 0), (0, n_pad - n)))
    rows = n_pad // _LANE
    x3 = x.reshape(B, rows, _LANE)
    y3 = y.reshape(B, rows, _LANE)

    tile_rows = min(rows, _round_up(max_tile_rows, granule))
    num_chunks = pl.cdiv(rows, tile_rows)
    ragged = (rows % tile_rows) != 0

    # 2 inputs x 2 pipeline buffers + elementwise temporaries + slack; capped
    # at 48 MiB so the same config fits v7x's 64 MiB-per-TC VMEM.
    block_bytes = tile_rows * _LANE * itemsize
    vmem_limit = int(min(48 * 1024 * 1024,
                         max(32 * 1024 * 1024, 8 * block_bytes)))

    kernel = _make_kernel(tile_rows, rows, ragged)

    partials = pl.pallas_call(
        kernel,
        out_shape=jax.ShapeDtypeStruct((B, 3, _SUBLANE, _LANE), jnp.float32),
        grid_spec=pltpu.PrefetchScalarGridSpec(
            num_scalar_prefetch=0,
            grid=(B, num_chunks),
            in_specs=[
                pl.BlockSpec((1, tile_rows, _LANE), lambda b, c: (b, c, 0)),
                pl.BlockSpec((1, tile_rows, _LANE), lambda b, c: (b, c, 0)),
            ],
            out_specs=pl.BlockSpec((1, 3, _SUBLANE, _LANE),
                                   lambda b, c: (b, 0, 0, 0)),
            scratch_shapes=[pltpu.VMEM((3, _SUBLANE, _LANE), jnp.float32)],
        ),
        compiler_params=pltpu.CompilerParams(
            dimension_semantics=("parallel", "arbitrary"),
            vmem_limit_bytes=vmem_limit,
        ),
    )(x3, y3)

    sums = jnp.sum(partials, axis=(2, 3))                 # (B, 3)
    w12, w11, w22 = sums[:, 0], sums[:, 1], sums[:, 2]
    # torch CosineSimilarity: cos = x.y / sqrt(clamp_min(||x||^2 ||y||^2, eps^2))
    cos = w12 / jnp.sqrt(jnp.maximum(w11 * w22, jnp.float32(eps) ** 2))
    distance = 1.0 - cos
    return jnp.sum(distance) / B


def feature_distance_ref(feature_dot, feature_tar, eps=1e-6):
    """Pure-JAX reference mirroring the PyTorch forward."""
    B = feature_dot.shape[0]
    x = feature_dot.reshape(B, -1).astype(jnp.float32)
    y = feature_tar.reshape(B, -1).astype(jnp.float32)
    w12 = jnp.sum(x * y, axis=1)
    w11 = jnp.sum(x * x, axis=1)
    w22 = jnp.sum(y * y, axis=1)
    cos = w12 / jnp.sqrt(jnp.maximum(w11 * w22, jnp.float32(eps) ** 2))
    return jnp.sum(1.0 - cos) / B


if __name__ == "__main__":
    key = jax.random.PRNGKey(0)
    k1, k2 = jax.random.split(key)
    feature_dot = jax.random.normal(k1, (2, 4, 16, 16), dtype=jnp.float32)
    feature_tar = jax.random.normal(k2, (2, 4, 16, 16), dtype=jnp.float32)

    out = feature_distance(feature_dot, feature_tar)
    out = jax.block_until_ready(out)

    ref = feature_distance_ref(feature_dot, feature_tar)
    assert jnp.allclose(out, ref, rtol=1e-5, atol=1e-5), (out, ref)

    print("KERNEL_OK")
</pallas_src>

<mosaic_0001>
module attributes {stable_mosaic.version = 11 : i64} {
  func.func @kernel(%arg0: i32, %arg1: i32, %arg2: memref<1x8x128xf32, #tpu.memory_space<vmem>>, %arg3: memref<1x8x128xf32, #tpu.memory_space<vmem>>, %arg4: memref<1x3x8x128xf32, #tpu.memory_space<vmem>>, %arg5: memref<3x8x128xf32, #tpu.memory_space<vmem>>) attributes {dimension_semantics = [#tpu.dimension_semantics<parallel>, #tpu.dimension_semantics<arbitrary>], iteration_bounds = array<i64: 2, 1>, scalar_prefetch = 0 : i64, scratch_operands = 1 : i64, tpu.core_type = #tpu.core_type<tc>, window_params = [{transform_indices = @transform_0, window_bounds = array<i64: 1, 8, 128>}, {transform_indices = @transform_1, window_bounds = array<i64: 1, 8, 128>}, {transform_indices = @transform_2, window_bounds = array<i64: 1, 3, 8, 128>}]} {
    %c0_i32 = arith.constant 0 : i32
    %0 = arith.cmpi eq, %arg1, %c0_i32 : i32
    %1 = arith.extui %0 : i1 to i32
    %c0_i32_0 = arith.constant 0 : i32
    %2 = arith.cmpi ne, %1, %c0_i32_0 : i32
    scf.if %2 {
      %cst_26 = arith.constant 0.000000e+00 : f32
      %37 = vector.broadcast %cst_26 : f32 to vector<3x8x128xf32>
      %c0_27 = arith.constant 0 : index
      %c0_28 = arith.constant 0 : index
      %c0_29 = arith.constant 0 : index
      %38 = vector.load %arg5[%c0_27, %c0_28, %c0_29] : memref<3x8x128xf32, #tpu.memory_space<vmem>>, vector<3x8x128xf32>
      tpu.vector_store %arg5[%c0_27, %c0_28, %c0_29], %37 {strides = array<i32>} : memref<3x8x128xf32, #tpu.memory_space<vmem>>, vector<3x8x128xf32>,
    } else {
    }
    %c0 = arith.constant 0 : index
    %c0_1 = arith.constant 0 : index
    %c0_2 = arith.constant 0 : index
    %3 = vector.load %arg2[%c0, %c0_1, %c0_2] : memref<1x8x128xf32, #tpu.memory_space<vmem>>, vector<1x8x128xf32>
    %4 = vector.shape_cast %3 : vector<1x8x128xf32> to vector<8x128xf32>
    %c0_3 = arith.constant 0 : index
    %c0_4 = arith.constant 0 : index
    %c0_5 = arith.constant 0 : index
    %5 = vector.load %arg3[%c0_3, %c0_4, %c0_5] : memref<1x8x128xf32, #tpu.memory_space<vmem>>, vector<1x8x128xf32>
    %6 = vector.shape_cast %5 : vector<1x8x128xf32> to vector<8x128xf32>
    %c0_6 = arith.constant 0 : index
    %c0_7 = arith.constant 0 : index
    %c0_8 = arith.constant 0 : index
    %7 = vector.load %arg5[%c0_6, %c0_7, %c0_8] : memref<3x8x128xf32, #tpu.memory_space<vmem>>, vector<1x8x128xf32>
    %8 = vector.shape_cast %7 : vector<1x8x128xf32> to vector<8x128xf32>
    %9 = arith.mulf %4, %6 : vector<8x128xf32>
    %10 = vector.shape_cast %9 : vector<8x128xf32> to vector<1x8x128xf32>
    %cst = arith.constant dense<0.000000e+00> : vector<8x128xf32>
    %11 = vector.multi_reduction <add>, %10, %cst [0] : vector<1x8x128xf32> to vector<8x128xf32>
    %12 = arith.addf %8, %11 : vector<8x128xf32>
    %c0_9 = arith.constant 0 : index
    %c0_10 = arith.constant 0 : index
    %c0_11 = arith.constant 0 : index
    %13 = vector.load %arg5[%c0_9, %c0_10, %c0_11] : memref<3x8x128xf32, #tpu.memory_space<vmem>>, vector<1x8x128xf32>
    %14 = vector.shape_cast %13 : vector<1x8x128xf32> to vector<8x128xf32>
    %15 = vector.shape_cast %12 : vector<8x128xf32> to vector<1x8x128xf32>
    tpu.vector_store %arg5[%c0_9, %c0_10, %c0_11], %15 {strides = array<i32>} : memref<3x8x128xf32, #tpu.memory_space<vmem>>, vector<1x8x128xf32>,
    %c1 = arith.constant 1 : index
    %c0_12 = arith.constant 0 : index
    %c0_13 = arith.constant 0 : index
    %16 = vector.load %arg5[%c1, %c0_12, %c0_13] : memref<3x8x128xf32, #tpu.memory_space<vmem>>, vector<1x8x128xf32>
    %17 = vector.shape_cast %16 : vector<1x8x128xf32> to vector<8x128xf32>
    %18 = arith.mulf %4, %4 : vector<8x128xf32>
    %19 = vector.shape_cast %18 : vector<8x128xf32> to vector<1x8x128xf32>
    %cst_14 = arith.constant dense<0.000000e+00> : vector<8x128xf32>
    %20 = vector.multi_reduction <add>, %19, %cst_14 [0] : vector<1x8x128xf32> to vector<8x128xf32>
    %21 = arith.addf %17, %20 : vector<8x128xf32>
    %c1_15 = arith.constant 1 : index
    %c0_16 = arith.constant 0 : index
    %c0_17 = arith.constant 0 : index
    %22 = vector.load %arg5[%c1_15, %c0_16, %c0_17] : memref<3x8x128xf32, #tpu.memory_space<vmem>>, vector<1x8x128xf32>
    %23 = vector.shape_cast %22 : vector<1x8x128xf32> to vector<8x128xf32>
    %24 = vector.shape_cast %21 : vector<8x128xf32> to vector<1x8x128xf32>
    tpu.vector_store %arg5[%c1_15, %c0_16, %c0_17], %24 {strides = array<i32>} : memref<3x8x128xf32, #tpu.memory_space<vmem>>, vector<1x8x128xf32>,
    %c2 = arith.constant 2 : index
    %c0_18 = arith.constant 0 : index
    %c0_19 = arith.constant 0 : index
    %25 = vector.load %arg5[%c2, %c0_18, %c0_19] : memref<3x8x128xf32, #tpu.memory_space<vmem>>, vector<1x8x128xf32>
    %26 = vector.shape_cast %25 : vector<1x8x128xf32> to vector<8x128xf32>
    %27 = arith.mulf %6, %6 : vector<8x128xf32>
    %28 = vector.shape_cast %27 : vector<8x128xf32> to vector<1x8x128xf32>
    %cst_20 = arith.constant dense<0.000000e+00> : vector<8x128xf32>
    %29 = vector.multi_reduction <add>, %28, %cst_20 [0] : vector<1x8x128xf32> to vector<8x128xf32>
    %30 = arith.addf %26, %29 : vector<8x128xf32>
    %c2_21 = arith.constant 2 : index
    %c0_22 = arith.constant 0 : index
    %c0_23 = arith.constant 0 : index
    %31 = vector.load %arg5[%c2_21, %c0_22, %c0_23] : memref<3x8x128xf32, #tpu.memory_space<vmem>>, vector<1x8x128xf32>
    %32 = vector.shape_cast %31 : vector<1x8x128xf32> to vector<8x128xf32>
    %33 = vector.shape_cast %30 : vector<8x128xf32> to vector<1x8x128xf32>
    tpu.vector_store %arg5[%c2_21, %c0_22, %c0_23], %33 {strides = array<i32>} : memref<3x8x128xf32, #tpu.memory_space<vmem>>, vector<1x8x128xf32>,
    %c0_i32_24 = arith.constant 0 : i32
    %34 = arith.cmpi eq, %arg1, %c0_i32_24 : i32
    %35 = arith.extui %34 : i1 to i32
    %c0_i32_25 = arith.constant 0 : i32
    %36 = arith.cmpi ne, %35, %c0_i32_25 : i32
    scf.if %36 {
      %c0_26 = arith.constant 0 : index
      %c0_27 = arith.constant 0 : index
      %c0_28 = arith.constant 0 : index
      %37 = vector.load %arg5[%c0_26, %c0_27, %c0_28] : memref<3x8x128xf32, #tpu.memory_space<vmem>>, vector<3x8x128xf32>
      %c0_29 = arith.constant 0 : index
      %c0_30 = arith.constant 0 : index
      %c0_31 = arith.constant 0 : index
      %c0_32 = arith.constant 0 : index
      %38 = vector.load %arg4[%c0_29, %c0_30, %c0_31, %c0_32] : memref<1x3x8x128xf32, #tpu.memory_space<vmem>>, vector<1x3x8x128xf32>
      %39 = vector.shape_cast %38 : vector<1x3x8x128xf32> to vector<3x8x128xf32>
      %40 = vector.shape_cast %37 : vector<3x8x128xf32> to vector<1x3x8x128xf32>
      tpu.vector_store %arg4[%c0_29, %c0_30, %c0_31, %c0_32], %40 {strides = array<i32>} : memref<1x3x8x128xf32, #tpu.memory_space<vmem>>, vector<1x3x8x128xf32>,
    } else {
    }
    return
  }
  func.func @transform_0(%arg0: i32, %arg1: i32) -> (i32, i32, i32) {
    %c0_i32 = arith.constant 0 : i32
    %c0_i32_0 = arith.constant 0 : i32
    return %arg0, %arg1, %c0_i32 : i32, i32, i32
  }
  func.func @transform_1(%arg0: i32, %arg1: i32) -> (i32, i32, i32) {
    %c0_i32 = arith.constant 0 : i32
    %c0_i32_0 = arith.constant 0 : i32
    return %arg0, %arg1, %c0_i32 : i32, i32, i32
  }
  func.func @transform_2(%arg0: i32, %arg1: i32) -> (i32, i32, i32, i32) {
    %c0_i32 = arith.constant 0 : i32
    %c0_i32_0 = arith.constant 0 : i32
    %c0_i32_1 = arith.constant 0 : i32
    %c0_i32_2 = arith.constant 0 : i32
    return %arg0, %c0_i32, %c0_i32_0, %c0_i32_1 : i32, i32, i32, i32
  }
}

</mosaic_0001>

<bundles_post_ra>
// kernel: tpu_custom_call.1
= control target key start
LH: loop header
LB: loop body
LE: loop exit
PB: predicated region body
PF: predicated region fallthrough
CT: control target
= control target key end

     0   :  { %7 = vsyncpa [#allocation4], 0  ;;  %s845_s0 = inlined_call_operand.hbm [shape: f32[2,8,128], index: 0, kind: input, shape index: {}]   ;;  %s846_s1 = inlined_call_operand.hbm [shape: f32[2,8,128], index: 1, kind: input, shape index: {}]   ;;  %s847_s2 = inlined_call_operand.hbm [shape: f32[2,3,8,128], index: 2, kind: output, shape index: {}]  }
   0x1   :  { %9 = vsyncpa [#allocation4 + $0x1], 0 }
   0x2   :  { %10 = vsyncpa [#allocation7], 0 }
   0x3   :  { %12 = vsyncpa [#allocation7 + $0x1], 0 }
   0x4   :  { %13 = vsyncpa [#allocation5], 0 }
   0x5   :  { %15 = vsyncpa [#allocation5 + $0x1], 0  ;;  %s622_s9 = smov 0   ;;  %s624_s10 = smov 0  }
   0x6   :  { %s626_s11 = smov 0   ;;  %s628_s12 = smov 0  }
   0x7   :  { %s630_s13 = smov 0   ;;  %s632_s14 = smov 0  }
   0x8 LB: > { %s369_s15 = sadd.s32 4294967295, %s600_s14   ;;  %s370_s16 = sadd.s32 4294967294, %s600_s14   ;;  %s600_s14 = sphi %s632_s14, %s21_s14   ;;  %s596_s13 = sphi %s630_s13, %s867_s13   ;;  %s592_s12 = sphi %s628_s12, %s866_s12   ;;  %s588_s11 = sphi %s626_s11, %s865_s11   ;;  %s584_s10 = sphi %s624_s10, %s864_s10   ;;  %s580_s9 = sphi %s622_s9, %s863_s9  }
   0x9   : > { %s33_s17 = sadd.s32 1, %s596_s13  ;;  %s42_s18 = sadd.s32 1, %s588_s11 }
   0xa   : > { %p35_p0 = scmp.ge.s32.totalorder %s33_s17, 2  ;;  %p49_p1 = scmp.ne.s32.totalorder %s588_s11, %s584_s10 }
   0xb   : > { %p50_p2 = scmp.eq.s32.totalorder %s600_s14, 0  ;;  %p55_p3 = scmp.ne.s32.totalorder %s584_s10, %s580_s9 }
   0xc   : > { %s869_s17 = smov (%p35_p0, %s33_s17), 0  ;;  %p56_p5 = scmp.eq.s32.totalorder %s369_s15, 0 }
   0xd   : > { %p663_p4 = por %p50_p2, %p49_p1  ;;  %s37_s20 = ssub.s32 %s596_s13, %s869_s17 }
   0xe   : > { %p107_p6 = scmp.eq.s32.totalorder %s369_s15, 1  ;;  %p40_p7 = scmp.eq.s32.totalorder %s37_s20, 0 }
   0xf   : > { %p669_p8 = por %p56_p5, %p55_p3  ;;  %p113_p10 = scmp.eq.s32.totalorder %s370_s16, 1 }
  0x10   : > { %p673_p9 = por %p107_p6, %p49_p1  ;;  %p402_p13 = scmp.lt.s32.totalorder %s600_s14, 2 }
  0x11   : > { %s851_s21 = scalar_select %p669_p8, 1, 0 }
  0x12   : > { %s852_s22 = scalar_select %p673_p9, 1, 0 }
  0x13   : > { %s678_s23 = scalar_select %p40_p7, %s588_s11, %s42_s18  }
  0x14   : > { %p680_p11 = por %p113_p10, %p55_p3  ;;  %s687_s25 = sand.u32 1, %s588_s11  }
  0x15   : > { %s373_s26 = sshll.u32 %s687_s25, 3  ;;  %s374_s27 = sshll.u32 %s596_s13, 7 }
  0x16   : > { %s853_s24 = scalar_select %p680_p11, 1, 0 }
  0x17   : > { %s696_s30 = scalar_lea.hbm %s845_s0, %s374_s27  ;;  %s137_s3 = scalar_lea.vmem [#allocation3], %s373_s26 }
  0x18   : > { %s145_s4 = sshll.u32 %s137_s3, 4  ;;  %p704_p0 = pnand %p402_p13, %p663_p4  ;;  %s700_s4 = int_to_ptr.vmem [resolvable:$true] %s145_s4 }
  0x19   : > { %s134_s6 = scalar_lea.sflag [#allocation4], %s687_s25  ;;  %s454_s7 = scalar_lea.hbm %s696_s30, 128 }
  0x1a   : > { %p455_p3 = scmp.ne.s32.totalorder %s696_s30, %s454_s7  ;;  %p456_p5 = pneg %p704_p0 }
  0x1b   : > { %s459_s16 = scalar_lea.hbm %s845_s0, 256  ;;  %p460_p4 = scmp.lt.u32.totalorder %s696_s30, %s845_s0 }
  0x1c   : > { %p457_p6 = pnand %p456_p5, %p455_p3  ;;  %p461_p10 = scmp.lt.u32.totalorder %s459_s16, %s454_s7 }
  0x1d   : > { %p463_p12 = scmp.lt.u32.totalorder %s454_s7, %s696_s30 }
  0x1e   : > { %p458_p7 = pneg %p457_p6  ;;  %p462_p13 = por %p461_p10, %p460_p4 }
  0x20   : > { %p464_p1 = por %p463_p12, %p462_p13 }
  0x22   : > { %p465_p2 = pnand %p464_p1, %p458_p7 }
  0x24   : > { %468 = shalt.err (!%p465_p2)
}
  0x25   : > { %s469_s20 = scalar_lea.vmem %s700_s4, 128  ;;  %s602_s28 = smov [#allocation3]  }
  0x26   : > { %p470_p3 = scmp.ne.s32.totalorder %s700_s4, %s469_s20  ;;  %s474_s29 = sshll.u32 %s602_s28, 4  ;;  %s475_s29 = int_to_ptr.vmem [resolvable:$false] %s474_s29 }
  0x27   : > { %s476_s3 = scalar_lea.vmem %s475_s29, 256  ;;  %p477_p9 = scmp.lt.s32.totalorder %s700_s4, %s475_s29 }
  0x28   : > { %p472_p6 = pnand %p470_p3, %p456_p5  ;;  %p478_p4 = scmp.lt.s32.totalorder %s476_s3, %s469_s20 }
  0x2a   : > { %p473_p11 = pneg %p472_p6  ;;  %p479_p10 = por %p478_p4, %p477_p9 }
  0x2c   : > { %p480_p12 = pnand %p479_p10, %p473_p11 }
  0x2e   : > { %483 = shalt.err (!%p480_p12)
}
  0x2f   : > { %394 = dma.hbm_to_vmem [thread:$0]  (!%p704_p0), %s696_s30, 128, %s700_s4, %s134_s6  }
  0x30   : > { %p855_p1 = scmp.lt.s32.totalorder %s600_s14, 3  ;;  %p856_p2 = scmp.ge.s32.totalorder %s600_s14, 1 }
  0x31   : > { %s749_s16 = scalar_lea.hbm %s846_s1, %s374_s27  ;;  %s156_s18 = scalar_lea.vmem [#allocation6], %s373_s26 }
  0x32   : > { %p740_p7 = pnand %p856_p2, %p855_p1  ;;  %s164_s19 = sshll.u32 %s156_s18, 4  ;;  %s165_s19 = int_to_ptr.vmem [resolvable:$true] %s164_s19 }
  0x33   : > { %s153_s30 = scalar_lea.sflag [#allocation7], %s687_s25  ;;  %s484_s4 = scalar_lea.hbm %s749_s16, 128 }
  0x34   : > { %s857_s7 = scalar_select %p740_p7, 1, 0 }
  0x35   : > { %p485_p9 = scmp.ne.s32.totalorder %s749_s16, %s484_s4  ;;  %s489_s27 = scalar_lea.hbm %s846_s1, 256 }
  0x36   : > { %p490_p3 = scmp.lt.u32.totalorder %s749_s16, %s846_s1  ;;  %p491_p6 = scmp.lt.u32.totalorder %s489_s27, %s484_s4 }
  0x37   : > { %p487_p11 = pnand %p485_p9, %p456_p5  ;;  %p493_p10 = scmp.lt.u32.totalorder %s484_s4, %s749_s16 }
  0x38   : > { %p492_p4 = por %p491_p6, %p490_p3 }
  0x39   : > { %p488_p13 = pneg %p487_p11 }
  0x3a   : > { %p494_p12 = por %p493_p10, %p492_p4 }
  0x3c   : > { %p495_p1 = pnand %p494_p12, %p488_p13 }
  0x3e   : > { %498 = shalt.err (!%p495_p1)
}
  0x3f   : > { %s499_s25 = scalar_lea.vmem %s165_s19, 128  ;;  %s603_s26 = smov [#allocation6]  }
  0x40   : > { %p500_p2 = scmp.ne.s32.totalorder %s165_s19, %s499_s25  ;;  %s504_s3 = sshll.u32 %s603_s26, 4  ;;  %s505_s3 = int_to_ptr.vmem [resolvable:$false] %s504_s3 }
  0x41   : > { %s506_s8 = scalar_lea.vmem %s505_s3, 256  ;;  %p507_p8 = scmp.lt.s32.totalorder %s165_s19, %s505_s3 }
  0x42   : > { %p502_p9 = pnand %p500_p2, %p456_p5  ;;  %p508_p7 = scmp.lt.s32.totalorder %s506_s8, %s499_s25 }
  0x44   : > { %p503_p11 = pneg %p502_p9  ;;  %p509_p3 = por %p508_p7, %p507_p8 }
  0x46   : > { %p510_p6 = pnand %p509_p3, %p503_p11 }
  0x48   : > { %513 = shalt.err (!%p510_p6)
}
  0x49   : > { %397 = dma.hbm_to_vmem [thread:$0]  (!%p704_p0), %s749_s16, 128, %s165_s19, %s153_s30  }
  0x4a   : > { %p858_p13 = scmp.ne.s32.totalorder %s857_s7, 0 }
  0x4b   : > { %s776_s15 = sand.u32 (!%p858_p13), 1, %s584_s10   ;;  %p859_p5 = scmp.ne.s32.totalorder (!%p858_p13), %s851_s21, 0 }
  0x4c   : > { %173 = sbr.rel (%p858_p13) target bundleno = 113 (0x71), region = 28  ;;  %s378_s18 = sshll.u32 (!%p858_p13), %s776_s15, 3 }
  0x4d   : > { %s176_s4 = scalar_lea.sflag (!%p858_p13), [#allocation4], %s776_s15  ;;  %s179_s6 = scalar_lea.vmem (!%p858_p13), [#allocation3], %s378_s18 }
  0x53   : > { %567 = dma.done.wait (%p859_p5), %s176_s4, 128  }
  0x54   : > { %569 = vsyncadd (%p859_p5), %s176_s4, 4294967168  ;;  %s185_s5 = scalar_lea.sflag [#allocation7], %s776_s15  ;;  %s188_s16 = scalar_lea.vmem [#allocation6], %s378_s18 }
  0x55   : > { %571 = dma.done.wait (%p859_p5), %s185_s5, 128  }
  0x56   : > { %573 = vsyncadd (%p859_p5), %s185_s5, 4294967168  ;;  %s383_s7 = smul.u32 24, %s776_s15  ;;  %v221_v0 = vld [vmem:[%s179_s6] sm:$0xff]  ;;  %v222_v1 = vld [vmem:[%s188_s16] sm:$0xff]  ;;  %p860_p0 = scmp.ne.s32.totalorder %s852_s22, 0 }
  0x57   : > { %s384_s19 = smul.u32 384, %s592_s12  ;;  %v224_v2 = vmul.f32 %v222_v1, %v221_v0  ;;  %v230_v3 = vmul.f32 %v221_v0, %v221_v0  ;;  %v236_v4 = vmul.f32 %v222_v1, %v222_v1  ;;  %s250_s12 = scalar_lea.sflag [#allocation5], %s776_s15 }
  0x58   : > { %s213_s30 = scalar_lea.vmem [#allocation8], %s383_s7  ;;  %s604_s25 = smov [#allocation8]  }
  0x59   : > { %s263_s20 = sshll.u32 %s213_s30, 4  ;;  %s796_s28 = scalar_lea.hbm %s847_s2, %s384_s19  ;;  %246 = vst [vmem:[%s213_s30] sm:$0xff] %v224_v2  ;;  %247 = vst [vmem:[%s213_s30 + $0x8] sm:$0xff] %v230_v3  ;;  %s791_s20 = int_to_ptr.vmem [resolvable:$true] %s263_s20 }
  0x5a   : > { %248 = vst [vmem:[%s213_s30 + $0x10] sm:$0xff] %v236_v4  ;;  %s514_s29 = scalar_lea.vmem %s791_s20, 384  ;;  %s518_s26 = sshll.u32 %s604_s25, 4  ;;  %s519_s26 = int_to_ptr.vmem [resolvable:$false] %s518_s26 }
  0x5b   : > { %p515_p8 = scmp.ne.s32.totalorder %s791_s20, %s514_s29  ;;  %s520_s3 = scalar_lea.vmem %s519_s26, 768 }
  0x5c   : > { %p521_p10 = scmp.lt.s32.totalorder %s791_s20, %s519_s26  ;;  %p522_p12 = scmp.lt.s32.totalorder %s520_s3, %s514_s29 }
  0x5d   : > { %p516_p7 = pnand %p515_p8, %p860_p0 }
  0x5e   : > { %p523_p1 = por %p522_p12, %p521_p10 }
  0x5f   : > { %p517_p4 = pneg %p516_p7 }
  0x61   : > { %p524_p2 = pnand %p523_p1, %p517_p4 }
  0x63   : > { %527 = shalt.err (!%p524_p2)
}
  0x64   : > { %s528_s8 = scalar_lea.hbm %s796_s28, 384  ;;  %s532_s6 = scalar_lea.hbm %s847_s2, 768 }
  0x65   : > { %p529_p9 = scmp.ne.s32.totalorder %s796_s28, %s528_s8  ;;  %p533_p6 = scmp.lt.u32.totalorder %s796_s28, %s847_s2 }
  0x66   : > { %p534_p13 = scmp.lt.u32.totalorder %s532_s6, %s528_s8  ;;  %p536_p8 = scmp.lt.u32.totalorder %s528_s8, %s796_s28 }
  0x67   : > { %p530_p11 = pnand %p529_p9, %p860_p0 }
  0x68   : > { %p535_p5 = por %p534_p13, %p533_p6 }
  0x69   : > { %p531_p3 = pneg %p530_p11 }
  0x6a   : > { %p537_p7 = por %p536_p8, %p535_p5 }
  0x6c   : > { %p538_p4 = pnand %p537_p7, %p531_p3 }
  0x6e   : > { %541 = shalt.err (!%p538_p4)
}
  0x6f   : > { %s605_s7 = smov 128   ;;  %s606_s19 = smov 8  }
  0x70   : > { %389 = dma.vmem_to_hbm [thread:$0]  (%p860_p0), %s791_s20, 384, %s796_s28, %s250_s12, %s605_s7, %s605_s7, %s606_s19  }
  0x71 PF: > { %s278_s30 = sand.u32 1, %s580_s9   ;;  %p861_p10 = scmp.ne.s32.totalorder %s853_s24, 0 }
  0x72   : > { %p862_p12 = scmp.ge.s32.totalorder %s600_s14, 2  ;;  %s279_s21 = scalar_lea.sflag [#allocation5], %s278_s30 }
  0x74   : > { %p399_p1 = pnand %p862_p12, %p861_p10 }
  0x76   : > { %575 = dma.done.wait (!%p399_p1), %s279_s21, 384  }
  0x77   : > { %577 = vsyncadd (!%p399_p1), %s279_s21, 4294966912  ;;  %s21_s14 = sadd.s32 1, %s600_s14   ;;  %s863_s9 = smov %s584_s10 }
  0x78   : > { %p18_p2 = scmp.ge.s32.totalorder %s21_s14, 4   ;;  %s864_s10 = smov %s588_s11 }
  0x79   : > { %s865_s11 = smov %s678_s23  ;;  %s866_s12 = smov %s596_s13 }
  0x7a   : > { %s867_s13 = smov %s869_s17  ;;  %20 = sbr.rel (!%p18_p2) target bundleno = 8 (0x8), region = 96 }
  0x81   :  { %284 = vsyncpa [#allocation4], 1 }
  0x82   :  { %286 = vsyncpa [#allocation4 + $0x1], 1 }
  0x83   :  { %287 = vsyncpa [#allocation7], 1 }
  0x84   :  { %289 = vsyncpa [#allocation7 + $0x1], 1 }
  0x85   :  { %290 = vsyncpa [#allocation5], 1 }
  0x86   :  { %292 = vsyncpa [#allocation5 + $0x1], 1 }

</bundles_post_ra>
